<compile_context>
chip_gen: v5e
topology: v5e:2x2
jax: 0.10.0
libtpu: 0.0.40
codegen_flags: <defaults>
</compile_context>

<pallas_src>
import numpy as np
import jax
import jax.numpy as jnp
from jax.experimental import pallas as pl
from jax.experimental.pallas import tpu as pltpu


def _round_up(n, m):
    return ((n + m - 1) // m) * m


# ----------------------------------------------------------------------------
# Fused kernel: (pool+conv as one matmul) + ReLU + fc1 + ReLU + fc3 + ReLU
# ----------------------------------------------------------------------------
def _fused_cnn_kernel(x_ref, m_ref, bc_ref, w1_ref, b1_ref, w3_ref, b3_ref, o_ref):
    # x_ref:  (TN, 576)  input tile (f32 or bf16) -- flattened 24x24, C=1
    # m_ref:  (576, 64)  bf16  folded avgpool+conv matrix (PyTorch view order)
    # bc_ref: (1, 64)    f32   conv bias per flattened feature (c*16 + i*4 + j)
    # w1_ref: (64, 128)  bf16  fc1 weight, zero-padded cols 30:128 (lane-dense h)
    # b1_ref: (1, 128)   f32   fc1 bias, zero-padded
    # w3_ref: (128, 24)  bf16  fc3 weight, zero rows 30:128
    # b3_ref: (1, 24)    f32   fc3 bias
    # o_ref:  (TN, 24)   f32   output tile (stored directly, no wrapper slice)
    x = x_ref[...].astype(jnp.bfloat16)                       # in-register cast
    f = jnp.dot(x, m_ref[...], preferred_element_type=jnp.float32) + bc_ref[...]
    f = jnp.maximum(f, 0.0)                                   # relu(conv1(avgpool(x)))
    # TODO(synk): nn.Dropout(0.5) is stochastic; implemented as eval-mode identity.
    h = jnp.dot(f.astype(jnp.bfloat16), w1_ref[...],
                preferred_element_type=jnp.float32) + b1_ref[...]
    h = jnp.maximum(h, 0.0)                                   # relu(fc1), lane-dense
    o = jnp.dot(h.astype(jnp.bfloat16), w3_ref[...],
                preferred_element_type=jnp.float32) + b3_ref[...]
    o_ref[...] = jnp.maximum(o, 0.0)                          # relu(fc3)


# ----------------------------------------------------------------------------
# Offline folding of avgpool + conv into a single (576, 64) matrix (numpy, exact)
# ----------------------------------------------------------------------------
def fold_params(params, compute_dtype=jnp.bfloat16):
    conv_w = np.asarray(params["conv_w"], np.float32)         # (4, 1, 5, 5)
    conv_b = np.asarray(params["conv_b"], np.float32)         # (4,)
    fc1_w = np.asarray(params["fc1_w"], np.float32)           # (30, 64)
    fc1_b = np.asarray(params["fc1_b"], np.float32)           # (30,)
    fc3_w = np.asarray(params["fc3_w"], np.float32)           # (24, 30)
    fc3_b = np.asarray(params["fc3_b"], np.float32)           # (24,)

    # AvgPool2d(3,3): pooled_flat = x_flat @ Ppool,  Ppool (576, 64)
    Ppool = np.zeros((24 * 24, 8 * 8), np.float32)
    for h in range(24):
        for w in range(24):
            Ppool[h * 24 + w, (h // 3) * 8 + (w // 3)] = 1.0 / 9.0

    # Conv2d(1->4, k=5, valid) as Toeplitz: conv_flat = pooled_flat @ C, C (64, 64)
    # column order == PyTorch x.view(-1, 64) order: c*16 + i*4 + j
    C = np.zeros((64, 64), np.float32)
    for a in range(8):
        for b in range(8):
            for c in range(4):
                for i in range(4):
                    for j in range(4):
                        u, v = a - i, b - j
                        if 0 <= u < 5 and 0 <= v < 5:
                            C[a * 8 + b, c * 16 + i * 4 + j] = conv_w[c, 0, u, v]

    M = Ppool @ C                                             # (576, 64) pool+conv
    bc = np.repeat(conv_b, 16).reshape(1, 64)                 # bias per feature

    w1 = np.zeros((64, 128), np.float32); w1[:, :30] = fc1_w.T
    b1 = np.zeros((1, 128), np.float32);  b1[:, :30] = fc1_b
    w3 = np.zeros((128, 24), np.float32); w3[:30, :] = fc3_w.T
    b3 = fc3_b.reshape(1, 24)

    return {
        "M": jnp.asarray(M, compute_dtype),
        "bc": jnp.asarray(bc, jnp.float32),
        "w1": jnp.asarray(w1, compute_dtype),
        "b1": jnp.asarray(b1, jnp.float32),
        "w3": jnp.asarray(w3, compute_dtype),
        "b3": jnp.asarray(b3, jnp.float32),
    }


# ----------------------------------------------------------------------------
# Full forward (mirrors CNN.forward), single pallas_call
# ----------------------------------------------------------------------------
def _choose_tile(n):
    if n < 8:
        return n            # single full-array block (block dim == array dim, legal)
    # >= 2 grid steps so v7x's second TensorCore shares the batch; cap at 1024 rows
    # (1024-row tiles sit at the measured ~85% HBM-roofline plateau and use < 10 MB
    #  VMEM double-buffered, within every generation's scoped limit).
    return min(1024, _round_up((n + 1) // 2, 8))


def cnn_forward(x, folded):
    # x: (N, 1, 24, 24), float32 or bfloat16 (NCHW, as PyTorch).
    N = x.shape[0]
    x_flat = x.reshape(N, 24 * 24)      # contiguous reshape -> free view, no HBM pass
    TN = _choose_tile(N)
    grid = pl.cdiv(N, TN)               # ragged last tile handled by Pallas masking

    const = lambda i: (0, 0)            # weights stay VMEM-resident across the grid
    itemsize = jnp.dtype(x_flat.dtype).itemsize
    weight_bytes = (576 * 64 + 64 * 128 + 128 * 24) * 2 + (64 + 128 + 24) * 4
    cost = pl.CostEstimate(
        flops=2 * N * (576 * 64 + 64 * 128 + 128 * 24),
        transcendentals=0,
        bytes_accessed=N * 576 * itemsize + N * 24 * 4 + weight_bytes,
    )

    out = pl.pallas_call(
        _fused_cnn_kernel,
        grid=(grid,),
        in_specs=[
            pl.BlockSpec((TN, 576), lambda i: (i, 0)),   # x streams over the batch
            pl.BlockSpec((576, 64), const),
            pl.BlockSpec((1, 64), const),
            pl.BlockSpec((64, 128), const),
            pl.BlockSpec((1, 128), const),
            pl.BlockSpec((128, 24), const),
            pl.BlockSpec((1, 24), const),
        ],
        out_specs=pl.BlockSpec((TN, 24), lambda i: (i, 0)),
        out_shape=jax.ShapeDtypeStruct((N, 24), jnp.float32),
        compiler_params=pltpu.CompilerParams(
            dimension_semantics=("parallel",),
            vmem_limit_bytes=32 * 1024 * 1024,   # explicit: v5e default is only 16 MiB
        ),
        cost_estimate=cost,
    )(x_flat, folded["M"], folded["bc"], folded["w1"], folded["b1"],
      folded["w3"], folded["b3"])

    if out.shape[0] == 1:                # x.squeeze(0) semantics
        out = jnp.squeeze(out, axis=0)
    return out


# ----------------------------------------------------------------------------
# Pure-JAX f32 reference (independent check of the kernel math)
# ----------------------------------------------------------------------------
def ref_forward(x, params):
    N = x.shape[0]
    hp = jax.lax.Precision.HIGHEST
    xi = x[:, 0, :, :].astype(jnp.float32)
    pooled = xi.reshape(N, 8, 3, 8, 3).mean(axis=(2, 4))                  # (N, 8, 8)
    conv = jax.lax.conv_general_dilated(
        pooled[:, None, :, :], params["conv_w"], (1, 1), "VALID",
        dimension_numbers=("NCHW", "OIHW", "NCHW"), precision=hp)         # (N, 4, 4, 4)
    conv = jax.nn.relu(conv + params["conv_b"][None, :, None, None])
    flat = conv.reshape(N, 64)
    h = jax.nn.relu(jnp.dot(flat, params["fc1_w"].T, precision=hp) + params["fc1_b"])
    out = jax.nn.relu(jnp.dot(h, params["fc3_w"].T, precision=hp) + params["fc3_b"])
    if out.shape[0] == 1:
        out = jnp.squeeze(out, axis=0)
    return out


# ----------------------------------------------------------------------------
# Deterministic parameter init (PyTorch-style uniform fan-in bounds)
# ----------------------------------------------------------------------------
def init_params(key):
    ks = jax.random.split(key, 6)

    def u(k, shape, fan_in):
        bound = 1.0 / np.sqrt(fan_in)
        return jax.random.uniform(k, shape, jnp.float32, -bound, bound)

    return {
        "conv_w": u(ks[0], (4, 1, 5, 5), 25),   # Conv2d(1, 4, 5)
        "conv_b": u(ks[1], (4,), 25),
        "fc1_w": u(ks[2], (30, 64), 64),        # Linear(64, 30)
        "fc1_b": u(ks[3], (30,), 64),
        "fc3_w": u(ks[4], (24, 30), 30),        # Linear(30, 24)
        "fc3_b": u(ks[5], (24,), 30),
    }


if __name__ == "__main__":
    key = jax.random.PRNGKey(0)
    pkey, xkey, xkey2 = jax.random.split(key, 3)
    params = init_params(pkey)
    folded = fold_params(params)                  # one-time offline fold

    # Primary check at the shape the module implies: 24x24 single-channel input
    # -> avgpool(3,3) -> 8x8 -> conv5 -> 4x4x4 -> view 64 -> fc1 -> fc3 (24 logits).
    x = jax.random.normal(xkey, (2, 1, 24, 24), jnp.float32)
    out = jax.block_until_ready(cnn_forward(x, folded))
    ref = jax.block_until_ready(ref_forward(x, params))
    assert out.shape == (2, 24), out.shape
    # bf16 compute (f32 accumulation) -> loosened tolerance per the review.
    np.testing.assert_allclose(np.asarray(out), np.asarray(ref), rtol=5e-2, atol=1e-2)

    # Secondary check: multi-step grid with a ragged last tile (N=50 -> TN=32, grid=2).
    x2 = jax.random.normal(xkey2, (50, 1, 24, 24), jnp.float32)
    out2 = jax.block_until_ready(cnn_forward(x2, folded))
    ref2 = jax.block_until_ready(ref_forward(x2, params))
    assert out2.shape == (50, 24), out2.shape
    np.testing.assert_allclose(np.asarray(out2), np.asarray(ref2), rtol=5e-2, atol=1e-2)

    print("KERNEL_OK")
</pallas_src>

<mosaic_0001>
module attributes {stable_mosaic.version = 11 : i64} {
  func.func @_fused_cnn_kernel(%arg0: i32, %arg1: memref<2x576xf32, #tpu.memory_space<vmem>>, %arg2: memref<576x64xbf16, #tpu.memory_space<vmem>>, %arg3: memref<1x64xf32, #tpu.memory_space<vmem>>, %arg4: memref<64x128xbf16, #tpu.memory_space<vmem>>, %arg5: memref<1x128xf32, #tpu.memory_space<vmem>>, %arg6: memref<128x24xbf16, #tpu.memory_space<vmem>>, %arg7: memref<1x24xf32, #tpu.memory_space<vmem>>, %arg8: memref<2x24xf32, #tpu.memory_space<vmem>>) attributes {dimension_semantics = [#tpu.dimension_semantics<parallel>], iteration_bounds = array<i64: 1>, scalar_prefetch = 0 : i64, scratch_operands = 0 : i64, tpu.core_type = #tpu.core_type<tc>, window_params = [{transform_indices = @transform_0, window_bounds = array<i64: 2, 576>}, {pipeline_mode = #tpu.pipeline_mode<synchronous>, transform_indices = @transform_1, window_bounds = array<i64: 576, 64>}, {pipeline_mode = #tpu.pipeline_mode<synchronous>, transform_indices = @transform_2, window_bounds = array<i64: 1, 64>}, {pipeline_mode = #tpu.pipeline_mode<synchronous>, transform_indices = @transform_3, window_bounds = array<i64: 64, 128>}, {pipeline_mode = #tpu.pipeline_mode<synchronous>, transform_indices = @transform_4, window_bounds = array<i64: 1, 128>}, {pipeline_mode = #tpu.pipeline_mode<synchronous>, transform_indices = @transform_5, window_bounds = array<i64: 128, 24>}, {pipeline_mode = #tpu.pipeline_mode<synchronous>, transform_indices = @transform_6, window_bounds = array<i64: 1, 24>}, {transform_indices = @transform_7, window_bounds = array<i64: 2, 24>}]} {
    %c0 = arith.constant 0 : index
    %c0_0 = arith.constant 0 : index
    %0 = vector.load %arg1[%c0, %c0_0] : memref<2x576xf32, #tpu.memory_space<vmem>>, vector<2x576xf32>
    %1 = arith.truncf %0 : vector<2x576xf32> to vector<2x576xbf16>
    %c0_1 = arith.constant 0 : index
    %c0_2 = arith.constant 0 : index
    %2 = vector.load %arg2[%c0_1, %c0_2] : memref<576x64xbf16, #tpu.memory_space<vmem>>, vector<576x64xbf16>
    %cst = arith.constant dense<0.000000e+00> : vector<2x64xf32>
    %3 = tpu.matmul %1, %2, %cst {dimension_numbers = #tpu.dot_dimension_numbers<[1], [0], [0], [1], [0, 0, 1, 1], [], []>} : vector<2x576xbf16>, vector<576x64xbf16>, vector<2x64xf32> -> vector<2x64xf32>
    %c0_3 = arith.constant 0 : index
    %c0_4 = arith.constant 0 : index
    %4 = vector.load %arg3[%c0_3, %c0_4] : memref<1x64xf32, #tpu.memory_space<vmem>>, vector<1x64xf32>
    %5 = vector.broadcast %4 : vector<1x64xf32> to vector<2x64xf32>
    %6 = arith.addf %3, %5 : vector<2x64xf32>
    %cst_5 = arith.constant 0.000000e+00 : f32
    %7 = vector.broadcast %cst_5 : f32 to vector<2x64xf32>
    %8 = arith.maximumf %6, %7 : vector<2x64xf32>
    %9 = arith.truncf %8 : vector<2x64xf32> to vector<2x64xbf16>
    %c0_6 = arith.constant 0 : index
    %c0_7 = arith.constant 0 : index
    %10 = vector.load %arg4[%c0_6, %c0_7] : memref<64x128xbf16, #tpu.memory_space<vmem>>, vector<64x128xbf16>
    %cst_8 = arith.constant dense<0.000000e+00> : vector<2x128xf32>
    %11 = tpu.matmul %9, %10, %cst_8 {dimension_numbers = #tpu.dot_dimension_numbers<[1], [0], [0], [1], [0, 0, 1, 1], [], []>} : vector<2x64xbf16>, vector<64x128xbf16>, vector<2x128xf32> -> vector<2x128xf32>
    %c0_9 = arith.constant 0 : index
    %c0_10 = arith.constant 0 : index
    %12 = vector.load %arg5[%c0_9, %c0_10] : memref<1x128xf32, #tpu.memory_space<vmem>>, vector<1x128xf32>
    %13 = vector.broadcast %12 : vector<1x128xf32> to vector<2x128xf32>
    %14 = arith.addf %11, %13 : vector<2x128xf32>
    %cst_11 = arith.constant 0.000000e+00 : f32
    %15 = vector.broadcast %cst_11 : f32 to vector<2x128xf32>
    %16 = arith.maximumf %14, %15 : vector<2x128xf32>
    %17 = arith.truncf %16 : vector<2x128xf32> to vector<2x128xbf16>
    %c0_12 = arith.constant 0 : index
    %c0_13 = arith.constant 0 : index
    %18 = vector.load %arg6[%c0_12, %c0_13] : memref<128x24xbf16, #tpu.memory_space<vmem>>, vector<128x24xbf16>
    %cst_14 = arith.constant dense<0.000000e+00> : vector<2x24xf32>
    %19 = tpu.matmul %17, %18, %cst_14 {dimension_numbers = #tpu.dot_dimension_numbers<[1], [0], [0], [1], [0, 0, 1, 1], [], []>} : vector<2x128xbf16>, vector<128x24xbf16>, vector<2x24xf32> -> vector<2x24xf32>
    %c0_15 = arith.constant 0 : index
    %c0_16 = arith.constant 0 : index
    %20 = vector.load %arg7[%c0_15, %c0_16] : memref<1x24xf32, #tpu.memory_space<vmem>>, vector<1x24xf32>
    %21 = vector.broadcast %20 : vector<1x24xf32> to vector<2x24xf32>
    %22 = arith.addf %19, %21 : vector<2x24xf32>
    %cst_17 = arith.constant 0.000000e+00 : f32
    %23 = vector.broadcast %cst_17 : f32 to vector<2x24xf32>
    %24 = arith.maximumf %22, %23 : vector<2x24xf32>
    %c0_18 = arith.constant 0 : index
    %c0_19 = arith.constant 0 : index
    %25 = vector.load %arg8[%c0_18, %c0_19] : memref<2x24xf32, #tpu.memory_space<vmem>>, vector<2x24xf32>
    tpu.vector_store %arg8[%c0_18, %c0_19], %24 {strides = array<i32>} : memref<2x24xf32, #tpu.memory_space<vmem>>, vector<2x24xf32>,
    return
  }
  func.func @transform_0(%arg0: i32) -> (i32, i32) {
    %c0_i32 = arith.constant 0 : i32
    %c0_i32_0 = arith.constant 0 : i32
    return %arg0, %c0_i32 : i32, i32
  }
  func.func @transform_1(%arg0: i32) -> (i32, i32) {
    %c0_i32 = arith.constant 0 : i32
    %c0_i32_0 = arith.constant 0 : i32
    %c0_i32_1 = arith.constant 0 : i32
    return %c0_i32, %c0_i32_0 : i32, i32
  }
  func.func @transform_2(%arg0: i32) -> (i32, i32) {
    %c0_i32 = arith.constant 0 : i32
    %c0_i32_0 = arith.constant 0 : i32
    %c0_i32_1 = arith.constant 0 : i32
    return %c0_i32, %c0_i32_0 : i32, i32
  }
  func.func @transform_3(%arg0: i32) -> (i32, i32) {
    %c0_i32 = arith.constant 0 : i32
    %c0_i32_0 = arith.constant 0 : i32
    %c0_i32_1 = arith.constant 0 : i32
    return %c0_i32, %c0_i32_0 : i32, i32
  }
  func.func @transform_4(%arg0: i32) -> (i32, i32) {
    %c0_i32 = arith.constant 0 : i32
    %c0_i32_0 = arith.constant 0 : i32
    %c0_i32_1 = arith.constant 0 : i32
    return %c0_i32, %c0_i32_0 : i32, i32
  }
  func.func @transform_5(%arg0: i32) -> (i32, i32) {
    %c0_i32 = arith.constant 0 : i32
    %c0_i32_0 = arith.constant 0 : i32
    %c0_i32_1 = arith.constant 0 : i32
    return %c0_i32, %c0_i32_0 : i32, i32
  }
  func.func @transform_6(%arg0: i32) -> (i32, i32) {
    %c0_i32 = arith.constant 0 : i32
    %c0_i32_0 = arith.constant 0 : i32
    %c0_i32_1 = arith.constant 0 : i32
    return %c0_i32, %c0_i32_0 : i32, i32
  }
  func.func @transform_7(%arg0: i32) -> (i32, i32) {
    %c0_i32 = arith.constant 0 : i32
    %c0_i32_0 = arith.constant 0 : i32
    return %arg0, %c0_i32 : i32, i32
  }
}

</mosaic_0001>

<bundles_post_ra>
// kernel: tpu_custom_call.1
= control target key start
LH: loop header
LB: loop body
LE: loop exit
PB: predicated region body
PF: predicated region fallthrough
CT: control target
= control target key end

     0   :  { %s1044_s0 = inlined_call_operand.vmem [shape: f32[2,576], index: 0, kind: input, shape index: {}]   ;;  %s1045_s1 = inlined_call_operand.vmem [shape: bf16[576,64], index: 1, kind: input, shape index: {}]   ;;  %s1046_s2 = inlined_call_operand.vmem [shape: f32[1,64], index: 2, kind: input, shape index: {}]   ;;  %s1047_s3 = inlined_call_operand.vmem [shape: bf16[64,128], index: 3, kind: input, shape index: {}]   ;;  %s1048_s4 = inlined_call_operand.vmem [shape: f32[1,128], index: 4, kind: input, shape index: {}]   ;;  %s1049_s5 = inlined_call_operand.vmem [shape: bf16[128,24], index: 5, kind: input, shape index: {}]   ;;  %s1050_s6 = inlined_call_operand.vmem [shape: f32[1,24], index: 6, kind: input, shape index: {}]   ;;  %s1051_s7 = inlined_call_operand.hbm [shape: f32[2,24], index: 7, kind: output, shape index: {}]  }
   0x1   :  { %v768_v0 = vld [vmem:[%s1045_s1 + $0x38] sm:$0xff]  ;;  %v767_v4 = vld [vmem:[%s1045_s1 + $0x30] sm:$0xff]  ;;  %v766_v8 = vld [vmem:[%s1045_s1 + $0x28] sm:$0xff] }
   0x2   :  { %v784_v1 = vld [vmem:[%s1045_s1 + $0xb8] sm:$0xff]  ;;  %346 = vmatpush.bf16.msra.mxu0 %v768_v0  ;;  %v783_v5 = vld [vmem:[%s1045_s1 + $0xb0] sm:$0xff]  ;;  %v782_v9 = vld [vmem:[%s1045_s1 + $0xa8] sm:$0xff] }
   0x3   :  { %v792_v2 = vld [vmem:[%s1045_s1 + $0xf8] sm:$0xff]  ;;  %372 = vmatpush.bf16.msra.mxu2 %v784_v1  ;;  %v791_v6 = vld [vmem:[%s1045_s1 + $0xf0] sm:$0xff]  ;;  %v790_v10 = vld [vmem:[%s1045_s1 + $0xe8] sm:$0xff] }
   0x4   :  { %v776_v3 = vld [vmem:[%s1045_s1 + $0x78] sm:$0xff]  ;;  %385 = vmatpush.bf16.msra.mxu3 %v792_v2  ;;  %v775_v7 = vld [vmem:[%s1045_s1 + $0x70] sm:$0xff]  ;;  %v774_v11 = vld [vmem:[%s1045_s1 + $0x68] sm:$0xff] }
   0x5   :  { %359 = vmatpush.bf16.msra.mxu1 %v776_v3  ;;  %v765_v12 = vld [vmem:[%s1045_s1 + $0x20] sm:$0xff]  ;;  %v29_v17 = vld [vmem:[%s1044_s0 + $0x8] sm:$0x3]  ;;  %v764_v18 = vld [vmem:[%s1045_s1 + $0x18] sm:$0xff] }
   0x6   :  { %347 = vmatpush.bf16.msra.mxu0 %v767_v4  ;;  %v781_v13 = vld [vmem:[%s1045_s1 + $0xa0] sm:$0xff]  ;;  %34 = vst [vmem:[#allocation1 + $0x20] ss:$4 sm:$0xff] %v29_v17  ;;  %v780_v19 = vld [vmem:[%s1045_s1 + $0x98] sm:$0xff] }
   0x7   :  { %373 = vmatpush.bf16.msra.mxu2 %v783_v5  ;;  %v28_v14 = vld [vmem:[%s1044_s0] sm:$0xff] }
   0x8   :  { %386 = vmatpush.bf16.msra.mxu3 %v791_v6  ;;  %v789_v15 = vld [vmem:[%s1045_s1 + $0xe0] sm:$0xff]  ;;  %32 = vst [vmem:[#allocation1] ss:$4 sm:$0xff] %v28_v14 }
   0x9   :  { %360 = vmatpush.bf16.msra.mxu1 %v775_v7  ;;  %v773_v16 = vld [vmem:[%s1045_s1 + $0x60] sm:$0xff] }
   0xa   :  { %348 = vmatpush.bf16.msra.mxu0 %v766_v8 }
   0xb   :  { %374 = vmatpush.bf16.msra.mxu2 %v782_v9 }
   0xc   :  { %387 = vmatpush.bf16.msra.mxu3 %v790_v10 }
   0xd   :  { %361 = vmatpush.bf16.msra.mxu1 %v774_v11 }
   0xe   :  { %349 = vmatpush.bf16.msra.mxu0 %v765_v12 }
   0xf   :  { %375 = vmatpush.bf16.msra.mxu2 %v781_v13 }
  0x10   :  { %12 = vsyncpa [#allocation3], 0  ;;  %388 = vmatpush.bf16.msra.mxu3 %v789_v15  ;;  %v788_v20 = vld [vmem:[%s1045_s1 + $0xd8] sm:$0xff]  ;;  %v763_v22 = vld [vmem:[%s1045_s1 + $0x10] sm:$0xff]  ;;  %vm342_vm0 = vcmask 523264   ;;  %s839_s9 = smov [#allocation2]  }
  0x11   :  { %362 = vmatpush.bf16.msra.mxu1 %v773_v16  ;;  %v772_v21 = vld [vmem:[%s1045_s1 + $0x58] sm:$0xff]  ;;  %v779_v23 = vld [vmem:[%s1045_s1 + $0x90] sm:$0xff]  ;;  %v762_v26 = vld [vmem:[%s1045_s1 + $0x8] sm:$0xff]  ;;  %s556_s10 = sshll.u32 %s839_s9, 4  ;;  %vm549_vm1 = vcmask 189440   ;;  %s557_s10 = int_to_ptr.vmem [resolvable:$true] %s556_s10 }
  0x12   :  { %350 = vmatpush.bf16.msra.mxu0 %v764_v18  ;;  %v787_v24 = vld [vmem:[%s1045_s1 + $0xd0] sm:$0xff]  ;;  %v778_v27 = vld [vmem:[%s1045_s1 + $0x88] sm:$0xff]  ;;  %v761_v30 = vld [vmem:[%s1045_s1] sm:$0xff] }
  0x13   :  { %376 = vmatpush.bf16.msra.mxu2 %v780_v19  ;;  %v771_v25 = vld [vmem:[%s1045_s1 + $0x50] sm:$0xff]  ;;  %v786_v28 = vld [vmem:[%s1045_s1 + $0xc8] sm:$0xff]  ;;  %v777_v31 = vld [vmem:[%s1045_s1 + $0x80] sm:$0xff] }
  0x14   :  { %389 = vmatpush.bf16.msra.mxu3 %v788_v20  ;;  %v770_v29 = vld [vmem:[%s1045_s1 + $0x48] sm:$0xff]  ;;  %v785_v32 = vld [vmem:[%s1045_s1 + $0xc0] sm:$0xff]  ;;  %v37_v35 = vld.sshfl [vmem:[#allocation1 + $0x10] sm:$0xff pattern:$0x73625140] }
  0x15   :  { %363 = vmatpush.bf16.msra.mxu1 %v772_v21  ;;  %v769_v33 = vld [vmem:[%s1045_s1 + $0x40] sm:$0xff]  ;;  %v38_v36 = vld.sshfl [vmem:[#allocation1 + $0x18] sm:$0xff pattern:$0x73625140]  ;;  %v47_v40 = vpack.c.bf16 %v37_v35, %v37_v35  ;;  %v795_v43 = vld [vmem:[%s1045_s1 + $0x110] sm:$0xff] }
  0x16   :  { %351 = vmatpush.bf16.msra.mxu0 %v763_v22  ;;  %v35_v34 = vld.sshfl [vmem:[#allocation1] sm:$0xff pattern:$0x73625140]  ;;  %v36_v37 = vld.sshfl [vmem:[#allocation1 + $0x8] sm:$0xff pattern:$0x73625140]  ;;  %v48_v41 = vpack.c.bf16 %v38_v36, %v38_v36 }
  0x17   :  { %377 = vmatpush.bf16.msra.mxu2 %v779_v23  ;;  %v796_v38 = vld [vmem:[%s1045_s1 + $0x118] sm:$0xff]  ;;  %v45_v39 = vpack.c.bf16 %v35_v34, %v35_v34  ;;  %v46_v42 = vpack.c.bf16 %v36_v37, %v36_v37  ;;  %v794_v44 = vld [vmem:[%s1045_s1 + $0x108] sm:$0xff]  ;;  %v793_v45 = vld [vmem:[%s1045_s1 + $0x100] sm:$0xff]  ;;  %s558_s1 = sshll.u32 %s1051_s7, 4  ;;  %s559_s1 = int_to_ptr.hbm [resolvable:$true] %s558_s1 }
  0x18   :  { %390 = vmatpush.bf16.msra.mxu3 %v787_v24  ;;  %v39_v46 = vld.sshfl [vmem:[#allocation1 + $0x20] sm:$0xff pattern:$0x73625140]  ;;  %v800_v48 = vld [vmem:[%s1047_s3 + $0x18] sm:$0xff]  ;;  %v799_v49 = vld [vmem:[%s1047_s3 + $0x10] sm:$0xff] }
  0x19   :  { %364 = vmatpush.bf16.msra.mxu1 %v771_v25  ;;  %v49_v47 = vpack.c.bf16 %v39_v46, %v39_v46  ;;  %v798_v50 = vld [vmem:[%s1047_s3 + $0x8] sm:$0xff]  ;;  %v797_v51 = vld [vmem:[%s1047_s3] sm:$0xff]  ;;  %v808_v52 = vld [vmem:[%s1049_s5 + $0x38] sm:$0xff] }
  0x1a   :  { %352 = vmatpush.bf16.msra.mxu0 %v762_v26  ;;  %v807_v53 = vld [vmem:[%s1049_s5 + $0x30] sm:$0xff]  ;;  %v806_v54 = vld [vmem:[%s1049_s5 + $0x28] sm:$0xff]  ;;  %v810_v56 = vld [vmem:[%s1046_s2] ss:$0 sm:$0xff] }
  0x1b   :  { %378 = vmatpush.bf16.msra.mxu2 %v778_v27  ;;  %v805_v58 = vld [vmem:[%s1049_s5 + $0x20] sm:$0xff]  ;;  %v804_v61 = vld [vmem:[%s1049_s5 + $0x18] sm:$0xff]  ;;  %v803_v2 = vld [vmem:[%s1049_s5 + $0x10] sm:$0xff] }
  0x1c   :  { %391 = vmatpush.bf16.msra.mxu3 %v786_v28  ;;  %v802_v12 = vld [vmem:[%s1049_s5 + $0x8] sm:$0xff]  ;;  %v801_v13 = vld [vmem:[%s1049_s5] sm:$0xff] }
  0x1d   :  { %365 = vmatpush.bf16.msra.mxu1 %v770_v29  ;;  %v811_v14 = vld [vmem:[%s1048_s4] ss:$0 sm:$0xff] }
  0x1e   :  { %353 = vmatpush.bf16.msra.mxu0 %v761_v30  ;;  %v812_v20 = vld [vmem:[%s1050_s6] ss:$0 sm:$0xff] }
  0x1f   :  { %379 = vmatpush.bf16.msra.mxu2 %v777_v31 }
  0x20   :  { %392 = vmatpush.bf16.msra.mxu3 %v785_v32 }
  0x21   :  { %366 = vmatpush.bf16.msra.mxu1 %v769_v33  ;;  %354 = vmatmul.bf16.vlgmr.msra.gmra.mxu0 %v45_v39 }
  0x22   :  { %402 = vmatpush.bf16.msrb.mxu0 %v796_v38  ;;  %380 = vmatmul.bf16.vlgmr.msra.gmra.mxu2 %v47_v40 }
  0x23   :  { %393 = vmatmul.bf16.vlgmr.msra.gmra.mxu3 %v48_v41  ;;  %535 = vmatpush.bf16.msrb.mxu2 %v808_v52 }
  0x24   :  { %367 = vmatmul.bf16.vlgmr.msra.gmra.mxu1 %v46_v42 }
  0x25   :  { %456 = vmatpush.bf16.msrb.mxu1 %v800_v48 }
  0x26   :  { %403 = vmatpush.bf16.msrb.mxu0 %v795_v43 }
  0x27   :  { %536 = vmatpush.bf16.msrb.mxu2 %v807_v53 }
  0x29   :  { %457 = vmatpush.bf16.msrb.mxu1 %v799_v49 }
  0x2a   :  { %404 = vmatpush.bf16.msrb.mxu0 %v794_v44 }
  0x2b   :  { %537 = vmatpush.bf16.msrb.mxu2 %v806_v54 }
  0x2d   :  { %458 = vmatpush.bf16.msrb.mxu1 %v798_v50 }
  0x2e   :  { %405 = vmatpush.bf16.msrb.mxu0 %v793_v45 }
  0x2f   :  { %538 = vmatpush.bf16.msrb.mxu2 %v805_v58 }
  0x31   :  { %711 = vmatmul.msk.bf16.vlgmr.msrb.gmra.mxu0 %vm342_vm0, %v49_v47  ;;  %459 = vmatpush.bf16.msrb.mxu1 %v797_v51 }
  0x33   :  { %539 = vmatpush.bf16.msrb.mxu2 %v804_v61 }
  0x37   :  { %540 = vmatpush.bf16.msrb.mxu2 %v803_v2 }
  0x3b   :  { %541 = vmatpush.bf16.msrb.mxu2 %v802_v12 }
  0x3f   :  { %542 = vmatpush.bf16.msrb.mxu2 %v801_v13 }
  0x9e   :  { %v355_v55 = vpop.f32.mrf.mxu0 }
  0x9f   :  { %v356_v59 = vadd.f32 %v810_v56, %v355_v55 }
  0xa1   :  { %v368_v57 = vpop.f32.mrf.mxu1 }
  0xa2   :  { %v369_v0 = vadd.f32 %v368_v57, %v356_v59 }
  0xa5   :  { %v381_v60 = vpop.f32.mrf.mxu2 }
  0xa6   :  { %v394_v62 = vpop.f32.mrf.mxu3  ;;  %v357_v63 = vpop.f32.mrf.mxu0  ;;  %v382_v3 = vadd.f32 %v381_v60, %v369_v0 }
  0xa8   :  { %v395_v5 = vadd.f32 %v394_v62, %v382_v3 }
  0xa9   :  { %v370_v1 = vpop.f32.mrf.mxu1 }
  0xad   :  { %v383_v4 = vpop.f32.mrf.mxu2 }
  0xae   :  { %v396_v6 = vpop.f32.mrf.mxu3  ;;  %v407_v7 = vpop.f32.mrf.mxu0 }
  0xaf   :  { %v408_v8 = vadd.f32 %v407_v7, %v395_v5 }
  0xb1   :  { %v411_v9 = vmax.f32 %v408_v8, 0.0 }
  0xb3   :  { %v412_v10 = vpack.c.bf16 %v411_v9, %v411_v9 }
  0xb5   :  { %728 = vmatmul.msk.bf16.vlgmr.msrb.gmra.mxu1 %vm342_vm0, %v412_v10 }
  0xb6   :  { %v409_v11 = vpop.f32.mrf.mxu0 }
 0x132   :  { %v461_v15 = vpop.f32.mrf.mxu1 }
 0x133   :  { %v462_v16 = vadd.f32 %v811_v14, %v461_v15 }
 0x135   :  { %v465_v17 = vmax.f32 %v462_v16, 0.0 }
 0x137   :  { %v466_v18 = vpack.c.bf16 %v465_v17, %v465_v17 }
 0x139   :  { %543 = vmatmul.bf16.vlgmr.msrb.gmra.mxu2 %v466_v18 }
 0x13a   :  { %v463_v19 = vpop.f32.mrf.mxu1 }
 0x1bc   :  { %v544_v21 = vpop.f32.mrf.mxu2 }
 0x1bd   :  { %v545_v22 = vadd.f32 %v812_v20, %v544_v21 }
 0x1bf   :  { %v548_v23 = vmax.f32 %v545_v22, 0.0 }
 0x1c1   :  { %550 = vst.msk [vmem:[#allocation2] sm:$0x3] %vm549_vm1, %v548_v23 }
 0x1c2   :  { %561 = dma.vmem_to_hbm [thread:$0]  %s557_s10, 32, %s559_s1, [#allocation3]  }
 0x1c4   :  { %v546_v24 = vpop.f32.mrf.mxu2 }
 0x1c5   :  { %837 = dma.done.wait [#allocation3], 32  }
 0x1c6   :  { %838 = vsyncadd [#allocation3], 4294967264 }
 0x1c7   :  { %566 = vsyncpa [#allocation3], 1 }

</bundles_post_ra>
